<compile_context>
chip_gen: v6e
topology: v6e:2x2x1
jax: 0.10.0
libtpu: 0.0.40
codegen_flags: <defaults>
</compile_context>

<pallas_src>
import jax
import jax.numpy as jnp
from jax.experimental import pallas as pl
from jax.experimental.pallas import tpu as pltpu


def _logreg_kernel(x_ref, w_ref, b_ref, o_ref):
    # logits = X_tile @ W_pad + b_pad   (MXU matmul, f32 accumulate)
    logits = jnp.dot(
        x_ref[...], w_ref[...], preferred_element_type=jnp.float32
    ) + b_ref[...]  # b_ref is (1, C_pad), broadcasts over rows

    # Numerically-stable row-wise softmax (dim=1).  Padded classes carry a
    # -1e30 bias so exp() maps them to 0 and they never touch the denominator.
    m = jnp.max(logits, axis=1, keepdims=True)
    e = jnp.exp(logits - m)
    denom = jnp.sum(e, axis=1, keepdims=True)
    o_ref[...] = (e * pl.reciprocal(denom, approx=True)).astype(o_ref.dtype)


def pt_logreg_forward(X, w, b, *, tile_n=1024):
    """softmax(X @ w + b, axis=1) via a batch-tiled Pallas kernel."""
    N, D = X.shape
    Dw, C = w.shape
    assert D == Dw and b.shape == (C,)

    X = X.astype(jnp.float32)
    w = w.astype(jnp.float32)
    b = b.astype(jnp.float32)

    # --- lane-dense class dimension: pad C up to a multiple of 128 ----------
    C_pad = ((C + 127) // 128) * 128
    w_p = jnp.pad(w, ((0, 0), (0, C_pad - C)))  # zero weight columns
    b_p = jnp.concatenate(
        [b, jnp.full((C_pad - C,), -1e30, dtype=jnp.float32)]
    ).reshape(1, C_pad)  # fake classes get a huge negative bias

    # --- batch tiling: large tiles (multiple of 8), pad N to a tile multiple -
    TN = min(tile_n, ((N + 7) // 8) * 8)
    N_pad = ((N + TN - 1) // TN) * TN
    X_p = jnp.pad(X, ((0, N_pad - N), (0, 0))) if N_pad != N else X

    out = pl.pallas_call(
        _logreg_kernel,
        out_shape=jax.ShapeDtypeStruct((N_pad, C_pad), jnp.float32),
        grid=(N_pad // TN,),
        in_specs=[
            pl.BlockSpec((TN, D), lambda i: (i, 0)),      # X: tiled over rows
            pl.BlockSpec((D, C_pad), lambda i: (0, 0)),   # w: resident
            pl.BlockSpec((1, C_pad), lambda i: (0, 0)),   # b: resident
        ],
        out_specs=pl.BlockSpec((TN, C_pad), lambda i: (i, 0)),
        compiler_params=pltpu.CompilerParams(
            dimension_semantics=("parallel",),            # shard tiles on v7x's 2 TCs
            vmem_limit_bytes=32 * 1024 * 1024,            # fits v5e..v7x comfortably
        ),
    )(X_p, w_p, b_p)

    return out[:N, :C]


def get_loss(probs, Yoh):
    """Cross-entropy: -mean(sum(Yoh * log(P), axis=1)).  Plain JAX glue."""
    return -jnp.mean(jnp.sum(Yoh * jnp.log(probs), axis=1))


if __name__ == "__main__":
    # Deterministic synthetic params/inputs (module __init__: w ~ randn(D, C), b = 0).
    N, D, C = 8, 32, 10
    key = jax.random.PRNGKey(0)
    kx, kw, ky = jax.random.split(key, 3)

    X = jax.random.normal(kx, (N, D), dtype=jnp.float32)
    w = jax.random.normal(kw, (D, C), dtype=jnp.float32)
    b = jnp.zeros((C,), dtype=jnp.float32)

    probs = pt_logreg_forward(X, w, b)
    probs = jax.block_until_ready(probs)

    # Sanity check against pure-JAX reference (tolerance loosened slightly for
    # the EUP approximate reciprocal used in the softmax denominator).
    ref = jax.nn.softmax(X @ w + b, axis=1)
    assert probs.shape == (N, C)
    assert jnp.allclose(probs, ref, atol=5e-3, rtol=5e-3)
    assert jnp.allclose(jnp.sum(probs, axis=1), 1.0, atol=5e-3)

    # Exercise the loss helper too (one-hot labels).
    labels = jax.random.randint(ky, (N,), 0, C)
    Yoh = jax.nn.one_hot(labels, C, dtype=jnp.float32)
    loss = jax.block_until_ready(get_loss(probs, Yoh))
    assert jnp.isfinite(loss)

    print("KERNEL_OK")
</pallas_src>

<mosaic_0001>
module attributes {stable_mosaic.version = 11 : i64} {
  func.func @_logreg_kernel(%arg0: i32, %arg1: memref<8x32xf32, #tpu.memory_space<vmem>>, %arg2: memref<32x128xf32, #tpu.memory_space<vmem>>, %arg3: memref<1x128xf32, #tpu.memory_space<vmem>>, %arg4: memref<8x128xf32, #tpu.memory_space<vmem>>) attributes {dimension_semantics = [#tpu.dimension_semantics<parallel>], iteration_bounds = array<i64: 1>, scalar_prefetch = 0 : i64, scratch_operands = 0 : i64, tpu.core_type = #tpu.core_type<tc>, window_params = [{transform_indices = @transform_0, window_bounds = array<i64: 8, 32>}, {pipeline_mode = #tpu.pipeline_mode<synchronous>, transform_indices = @transform_1, window_bounds = array<i64: 32, 128>}, {pipeline_mode = #tpu.pipeline_mode<synchronous>, transform_indices = @transform_2, window_bounds = array<i64: 1, 128>}, {transform_indices = @transform_3, window_bounds = array<i64: 8, 128>}]} {
    %c0 = arith.constant 0 : index
    %c0_0 = arith.constant 0 : index
    %0 = vector.load %arg1[%c0, %c0_0] : memref<8x32xf32, #tpu.memory_space<vmem>>, vector<8x32xf32>
    %c0_1 = arith.constant 0 : index
    %c0_2 = arith.constant 0 : index
    %1 = vector.load %arg2[%c0_1, %c0_2] : memref<32x128xf32, #tpu.memory_space<vmem>>, vector<32x128xf32>
    %cst = arith.constant dense<0.000000e+00> : vector<8x128xf32>
    %2 = tpu.matmul %0, %1, %cst {dimension_numbers = #tpu.dot_dimension_numbers<[1], [0], [0], [1], [0, 0, 1, 1], [], []>} : vector<8x32xf32>, vector<32x128xf32>, vector<8x128xf32> -> vector<8x128xf32>
    %c0_3 = arith.constant 0 : index
    %c0_4 = arith.constant 0 : index
    %3 = vector.load %arg3[%c0_3, %c0_4] : memref<1x128xf32, #tpu.memory_space<vmem>>, vector<1x128xf32>
    %4 = vector.broadcast %3 : vector<1x128xf32> to vector<8x128xf32>
    %5 = arith.addf %2, %4 : vector<8x128xf32>
    %cst_5 = arith.constant dense<0xFF800000> : vector<8xf32>
    %6 = vector.multi_reduction <maximumf>, %5, %cst_5 [1] : vector<8x128xf32> to vector<8xf32>
    %7 = vector.shape_cast %6 : vector<8xf32> to vector<8x1xf32>
    %8 = vector.broadcast %7 : vector<8x1xf32> to vector<8x128xf32>
    %9 = arith.subf %5, %8 : vector<8x128xf32>
    %10 = math.exp %9 : vector<8x128xf32>
    %cst_6 = arith.constant dense<0.000000e+00> : vector<8xf32>
    %11 = vector.multi_reduction <add>, %10, %cst_6 [1] : vector<8x128xf32> to vector<8xf32>
    %12 = vector.shape_cast %11 : vector<8xf32> to vector<8x1xf32>
    %13 = tpu.reciprocal %12 {approx = true} : vector<8x1xf32> -> vector<8x1xf32>
    %14 = vector.broadcast %13 : vector<8x1xf32> to vector<8x128xf32>
    %15 = arith.mulf %10, %14 : vector<8x128xf32>
    %c0_7 = arith.constant 0 : index
    %c0_8 = arith.constant 0 : index
    %16 = vector.load %arg4[%c0_7, %c0_8] : memref<8x128xf32, #tpu.memory_space<vmem>>, vector<8x128xf32>
    tpu.vector_store %arg4[%c0_7, %c0_8], %15 {strides = array<i32>} : memref<8x128xf32, #tpu.memory_space<vmem>>, vector<8x128xf32>,
    return
  }
  func.func @transform_0(%arg0: i32) -> (i32, i32) {
    %c0_i32 = arith.constant 0 : i32
    %c0_i32_0 = arith.constant 0 : i32
    return %arg0, %c0_i32 : i32, i32
  }
  func.func @transform_1(%arg0: i32) -> (i32, i32) {
    %c0_i32 = arith.constant 0 : i32
    %c0_i32_0 = arith.constant 0 : i32
    %c0_i32_1 = arith.constant 0 : i32
    return %c0_i32, %c0_i32_0 : i32, i32
  }
  func.func @transform_2(%arg0: i32) -> (i32, i32) {
    %c0_i32 = arith.constant 0 : i32
    %c0_i32_0 = arith.constant 0 : i32
    %c0_i32_1 = arith.constant 0 : i32
    return %c0_i32, %c0_i32_0 : i32, i32
  }
  func.func @transform_3(%arg0: i32) -> (i32, i32) {
    %c0_i32 = arith.constant 0 : i32
    %c0_i32_0 = arith.constant 0 : i32
    return %arg0, %c0_i32 : i32, i32
  }
}

</mosaic_0001>

<bundles_post_ra>
// kernel: tpu_custom_call.1
= control target key start
LH: loop header
LB: loop body
LE: loop exit
PB: predicated region body
PF: predicated region fallthrough
CT: control target
= control target key end

     0   :  { %8 = vsyncpa [#allocation3], 0  ;;  %s287_s0 = inlined_call_operand.hbm [shape: f32[8,32], index: 0, kind: input, shape index: {}]   ;;  %s288_s1 = inlined_call_operand.hbm [shape: f32[32,128], index: 1, kind: input, shape index: {}]   ;;  %s289_s2 = inlined_call_operand.vmem [shape: f32[1,128], index: 2, kind: input, shape index: {}]   ;;  %s290_s3 = inlined_call_operand.hbm [shape: f32[8,128], index: 3, kind: output, shape index: {}]  }
   0x1   :  { %9 = vsyncpa [#allocation6], 0 }
   0x2   :  { %10 = vsyncpa [#allocation4], 0  ;;  %s248_s12 = smov [#allocation2]   ;;  %s249_s14 = smov [#allocation5]  }
   0x3   :  { %s17_s13 = sshll.u32 %s248_s12, 4  ;;  %s26_s15 = sshll.u32 %s249_s14, 4  ;;  %s18_s13 = int_to_ptr.vmem [resolvable:$true] %s17_s13  ;;  %s27_s15 = int_to_ptr.vmem [resolvable:$true] %s26_s15 }
   0x4   :  { %s190_s16 = scalar_lea.vmem %s18_s13, 128  ;;  %p195_p1 = scmp.lt.s32.totalorder %s18_s13, %s18_s13 }
   0x5   :  { %p191_p0 = scmp.ne.s32.totalorder %s18_s13, %s190_s16  ;;  %p196_p2 = scmp.lt.s32.totalorder %s190_s16, %s190_s16 }
   0x7   :  { %p197_p3 = por %p196_p2, %p195_p1 }
   0x9   :  { %p198_p4 = pnand %p197_p3, %p191_p0 }
   0xb   :  { %201 = shalt.err (!%p198_p4)
}
   0xc   :  { %20 = dma.hbm_to_vmem [thread:$0]  %s287_s0, 128, %s18_s13, [#allocation3]  }
   0xd   :  { %s210_s19 = scalar_lea.vmem %s27_s15, 512  ;;  %p215_p6 = scmp.lt.s32.totalorder %s27_s15, %s27_s15 }
   0xe   :  { %p211_p5 = scmp.ne.s32.totalorder %s27_s15, %s210_s19  ;;  %p216_p7 = scmp.lt.s32.totalorder %s210_s19, %s210_s19 }
  0x10   :  { %p217_p8 = por %p216_p7, %p215_p6 }
  0x12   :  { %p218_p9 = pnand %p217_p8, %p211_p5 }
  0x14   :  { %221 = shalt.err (!%p218_p9)
}
  0x15   :  { %s250_s20 = smov 128   ;;  %s251_s21 = smov 8  }
  0x16   :  { %32 = dma.hbm_to_vmem [thread:$0]  %s288_s1, 512, %s27_s15, [#allocation6], %s250_s20, %s250_s20, %s251_s21  }
  0x17   :  { %242 = dma.done.wait [#allocation3], 128  }
  0x18   :  { %243 = vsyncadd [#allocation3], 4294967168 }
  0x19   :  { %244 = dma.done.wait [#allocation6], 512  }
  0x1a   :  { %245 = vsyncadd [#allocation6], 4294966784  ;;  %v252_v0 = vmov 0.0   ;;  %vm253_vm0 = vmmov 0   ;;  %v45_v1 = vld [vmem:[#allocation5 + $0x18] sm:$0xff]  ;;  %v44_v2 = vld [vmem:[#allocation5 + $0x10] sm:$0xff] }
  0x1b   :  { %160 = vmatprep.subr.mxu0 %v252_v0  ;;  %168 = vmatprep.mubr.msk.f32.mxu0 %vm253_vm0, %v252_v0  ;;  %v43_v3 = vld [vmem:[#allocation5 + $0x8] sm:$0xff]  ;;  %v42_v4 = vld [vmem:[#allocation5] sm:$0xff]  ;;  %v41_v5 = vld [vmem:[#allocation2] sm:$0xff]  ;;  %vm53_vm1 = vcmask 261120   ;;  %s254_s24 = smov [#allocation7]  }
  0x1c   :  { %161 = vmatpush3.msra.mxu0 %v45_v1  ;;  %v153_v6 = vld [vmem:[%s289_s2] ss:$0 sm:$0xff]  ;;  %s143_s25 = sshll.u32 %s254_s24, 4  ;;  %s144_s25 = int_to_ptr.vmem [resolvable:$true] %s143_s25 }
  0x1d   :  { %162 = vmatprep.subr.mxu0 %v252_v0  ;;  %s222_s26 = scalar_lea.vmem %s144_s25, 128  ;;  %p227_p11 = scmp.lt.s32.totalorder %s144_s25, %s144_s25 }
  0x1e   :  { %163 = vmatpush3.msra.mxu0 %v44_v2  ;;  %p223_p10 = scmp.ne.s32.totalorder %s144_s25, %s222_s26  ;;  %p228_p12 = scmp.lt.s32.totalorder %s222_s26, %s222_s26 }
  0x1f   :  { %164 = vmatprep.subr.mxu0 %v252_v0 }
  0x20   :  { %165 = vmatpush3.msra.mxu0 %v43_v3  ;;  %p229_p13 = por %p228_p12, %p227_p11 }
  0x21   :  { %166 = vmatprep.subr.mxu0 %v252_v0 }
  0x22   :  { %167 = vmatpush3.msra.mxu0 %v42_v4  ;;  %p230_p0 = pnand %p229_p13, %p223_p10 }
  0x23   :  { %169 = vmatmul.mubr.msk.f32.vlgmr.msra.gmra.mxu0 %vm53_vm1, %v41_v5 }
  0xe3   :  { %v123_v7 = vpop.f32.mrf.mxu0 }
  0xe4   :  { %v124_v8 = vadd.f32 %v153_v6, %v123_v7 }
  0xe5   :  { %v170_v9 = vpop.f32.mrf.mxu0 }
  0xe6   :  { %127 = vmax.xlane.f32.xlu0 %v124_v8 }
 0x16f   :  { %v128_v10 = vpop.xlane.xlu0 %127 }
 0x170   :  { %v129_v11 = vsub.f32 %v124_v8, %v128_v10 }
 0x172   :  { %v130_v12 = vmul.f32 1.442695, %v129_v11 }
 0x174   :  { %178 = vpow2.f32 %v130_v12 }
 0x181   :  { %v179_v13 = vpop.eup %178 }
 0x182   :  { %132 = vadd.xlane.f32.xlu0 %v179_v13 }
 0x20b   :  { %v133_v14 = vpop.xlane.xlu0 %132 }
 0x20c   :  { %180 = vrcp.f32 %v133_v14 }
 0x219   :  { %v181_v15 = vpop.eup %180 }
 0x21a   :  { %v135_v16 = vmul.f32 %v181_v15, %v179_v13 }
 0x21c   :  { %136 = vst [vmem:[#allocation7] sm:$0xff] %v135_v16 }
 0x21d   :  { %233 = shalt.err (!%p230_p0)
}
 0x21e   :  { %146 = dma.vmem_to_hbm [thread:$0]  %s144_s25, 128, %s290_s3, [#allocation4]  }
 0x21f   :  { %246 = dma.done.wait [#allocation4], 128  }
 0x220   :  { %247 = vsyncadd [#allocation4], 4294967168 }
 0x221   :  { %150 = vsyncpa [#allocation3], 1 }
 0x222   :  { %151 = vsyncpa [#allocation6], 1 }
 0x223   :  { %152 = vsyncpa [#allocation4], 1 }

</bundles_post_ra>
